<compile_context>
chip_gen: v6e
topology: v6e:2x2x1
jax: 0.10.0
libtpu: 0.0.40
codegen_flags: <defaults>
</compile_context>

<pallas_src>
import jax
import jax.numpy as jnp
from jax.experimental import pallas as pl
from jax.experimental.pallas import tpu as pltpu

_LANES = 128
_TILE_ROWS = 4096                             # 4096 x 128 f32 = 2 MiB per block
_SINGLE_BLOCK_ELEMS = _TILE_ROWS * _LANES     # <= 2 MiB -> one full-array block


def _floor_div_kernel(d_ref, x_ref, o_ref):
    # torch.div(x, d, rounding_mode='floor') == floor(true_divide(x, d)).
    # The following torch.ceil is an identity on an already-floored value,
    # so it is elided.
    o_ref[...] = jnp.floor(x_ref[...] / d_ref[0, 0])


def _single_block_call(d_arr, x):
    n = x.size
    return pl.pallas_call(
        _floor_div_kernel,
        out_shape=jax.ShapeDtypeStruct(x.shape, jnp.float32),
        in_specs=[
            pl.BlockSpec(memory_space=pltpu.MemorySpace.SMEM),   # divisor scalar
            pl.BlockSpec(memory_space=pltpu.MemorySpace.VMEM),   # whole array
        ],
        out_specs=pl.BlockSpec(memory_space=pltpu.MemorySpace.VMEM),
        cost_estimate=pl.CostEstimate(
            flops=2 * n, transcendentals=0, bytes_accessed=8 * n + 4),
    )(d_arr, x)


def _tiled_call(d_arr, x_slab):
    rows = x_slab.shape[0]
    n = x_slab.size
    grid = (pl.cdiv(rows, _TILE_ROWS),)
    return pl.pallas_call(
        _floor_div_kernel,
        out_shape=jax.ShapeDtypeStruct((rows, _LANES), jnp.float32),
        grid=grid,
        in_specs=[
            pl.BlockSpec(memory_space=pltpu.MemorySpace.SMEM),
            pl.BlockSpec((_TILE_ROWS, _LANES), lambda i: (i, 0)),
        ],
        out_specs=pl.BlockSpec((_TILE_ROWS, _LANES), lambda i: (i, 0)),
        compiler_params=pltpu.CompilerParams(
            dimension_semantics=("parallel",)),
        cost_estimate=pl.CostEstimate(
            flops=2 * n, transcendentals=0, bytes_accessed=8 * n + 4),
    )(d_arr, x_slab)


def model_forward(x3, x2):
    """Pallas equivalent of Model.forward: ceil(floor_div(x2, x3)) -> float32."""
    x2 = jnp.asarray(x2, dtype=jnp.float32)
    d_arr = jnp.full((1, 1), x3, dtype=jnp.float32)   # runtime scalar -> SMEM

    n = x2.size
    if n <= _SINGLE_BLOCK_ELEMS:
        # Small / moderate input (covers the module's real (17, 64) case):
        # one full-array block, no padding, no reshape, no output slice.
        return _single_block_call(d_arr, x2)

    # Large input: stream as lane-dense (rows, 128) slab with 2 MiB tiles.
    orig_shape = x2.shape
    xf = x2.reshape(-1)
    tail_pad = (-n) % _LANES
    if tail_pad:
        xf = jnp.pad(xf, (0, tail_pad))   # only the ragged tail (< 512 B)
    x_slab = xf.reshape(-1, _LANES)
    out = _tiled_call(d_arr, x_slab).reshape(-1)
    if tail_pad:
        out = out[:n]
    return out.reshape(orig_shape)


if __name__ == "__main__":
    key = jax.random.PRNGKey(0)
    # Shapes from the module: x2 is (17, 64); x3 is the scalar 0.001
    x2 = jax.random.normal(key, (17, 64), dtype=jnp.float32)
    x3 = 0.001

    out = model_forward(x3, x2)
    out = jax.block_until_ready(out)

    # Reference in plain JAX: floor-div then ceil (ceil is identity here).
    ref = jnp.ceil(jnp.floor(x2 / jnp.float32(x3)))
    assert out.shape == (17, 64) and out.dtype == jnp.float32
    assert bool(jnp.allclose(out, ref)), "mismatch vs reference"

    print("KERNEL_OK")
</pallas_src>

<mosaic_0001>
module attributes {stable_mosaic.version = 11 : i64} {
  func.func @_floor_div_kernel(%arg0: memref<1x1xf32, #tpu.memory_space<smem>>, %arg1: memref<17x64xf32, #tpu.memory_space<vmem>>, %arg2: memref<17x64xf32, #tpu.memory_space<vmem>>) attributes {dimension_semantics = [], scalar_prefetch = 0 : i64, scratch_operands = 0 : i64, tpu.core_type = #tpu.core_type<tc>} {
    %c0 = arith.constant 0 : index
    %c0_0 = arith.constant 0 : index
    %0 = vector.load %arg1[%c0, %c0_0] : memref<17x64xf32, #tpu.memory_space<vmem>>, vector<17x64xf32>
    %c0_1 = arith.constant 0 : index
    %c0_2 = arith.constant 0 : index
    %1 = memref.load %arg0[%c0_1, %c0_2] : memref<1x1xf32, #tpu.memory_space<smem>>
    %2 = vector.broadcast %1 : f32 to vector<17x64xf32>
    %3 = arith.divf %0, %2 : vector<17x64xf32>
    %4 = math.floor %3 : vector<17x64xf32>
    %c0_3 = arith.constant 0 : index
    %c0_4 = arith.constant 0 : index
    %5 = vector.load %arg2[%c0_3, %c0_4] : memref<17x64xf32, #tpu.memory_space<vmem>>, vector<17x64xf32>
    tpu.vector_store %arg2[%c0_3, %c0_4], %4 {strides = array<i32>} : memref<17x64xf32, #tpu.memory_space<vmem>>, vector<17x64xf32>,
    return
  }
}

</mosaic_0001>

<bundles_post_ra>
// kernel: tpu_custom_call.1
= control target key start
LH: loop header
LB: loop body
LE: loop exit
PB: predicated region body
PF: predicated region fallthrough
CT: control target
= control target key end

     0   :  { %8 = vsyncpa [#allocation4], 0  ;;  %s145_s0 = inlined_call_operand.<no memory space> [shape: f32[1,1], index: 0, kind: input, shape index: {}]   ;;  %s146_s1 = inlined_call_operand.hbm [shape: f32[17,64], index: 1, kind: input, shape index: {}]   ;;  %s147_s2 = inlined_call_operand.hbm [shape: f32[17,64], index: 2, kind: output, shape index: {}]  }
   0x1   :  { %9 = vsyncpa [#allocation5], 0  ;;  %s111_s9 = smov [#allocation3]  }
   0x2   :  { %s17_s10 = sshll.u32 %s111_s9, 4  ;;  %s18_s10 = int_to_ptr.vmem [resolvable:$true] %s17_s10 }
   0x3   :  { %s75_s11 = scalar_lea.vmem %s18_s10, 384  ;;  %p80_p1 = scmp.lt.s32.totalorder %s18_s10, %s18_s10 }
   0x4   :  { %p76_p0 = scmp.ne.s32.totalorder %s18_s10, %s75_s11  ;;  %p81_p2 = scmp.lt.s32.totalorder %s75_s11, %s75_s11 }
   0x6   :  { %p82_p3 = por %p81_p2, %p80_p1 }
   0x8   :  { %p83_p4 = pnand %p82_p3, %p76_p0 }
   0xa   :  { %86 = shalt.err (!%p83_p4)
}
   0xb   :  { %s112_s12 = smov 128   ;;  %s113_s13 = smov 8  }
   0xc   :  { %23 = dma.hbm_to_vmem [thread:$0]  %s146_s1, 384, %s18_s10, [#allocation4], %s112_s12, %s112_s12, %s113_s13  }
   0xd   :  { %107 = dma.done.wait [#allocation4], 384  }
   0xe   :  { %108 = vsyncadd [#allocation4], 4294966912  ;;  %v31_v0 = vstv %s145_s0  ;;  %v27_v1 = vld [vmem:[#allocation3] sm:$0xff]  ;;  %v28_v2 = vld [vmem:[#allocation3 + $0x8] sm:$0xff]  ;;  %s114_s18 = smov [#allocation6]   ;;  %vm39_vm0 = vcmask 523264  }
   0xf   :  { %65 = vrcp.f32 %v31_v0  ;;  %v29_v3 = vld [vmem:[#allocation3 + $0x10] sm:$0x1]  ;;  %s49_s19 = sshll.u32 %s114_s18, 4  ;;  %vm42_vm1 = vcmask 516096   ;;  %s50_s19 = int_to_ptr.vmem [resolvable:$true] %s49_s19 }
  0x10   :  { %s87_s0 = scalar_lea.vmem %s50_s19, 384  ;;  %p92_p6 = scmp.lt.s32.totalorder %s50_s19, %s50_s19 }
  0x11   :  { %p88_p5 = scmp.ne.s32.totalorder %s50_s19, %s87_s0  ;;  %p93_p7 = scmp.lt.s32.totalorder %s87_s0, %s87_s0 }
  0x13   :  { %p94_p8 = por %p93_p7, %p92_p6 }
  0x15   :  { %p95_p9 = pnand %p94_p8, %p88_p5 }
  0x1c   :  { %v66_v4 = vpop.eup %65 }
  0x1d   :  { %v33_v5 = vmul.f32 %v66_v4, %v27_v1  ;;  %v34_v6 = vmul.f32 %v66_v4, %v28_v2  ;;  %v35_v7 = vmul.f32 %v66_v4, %v29_v3 }
  0x1f   :  { %v36_v8 = vfloor.f32 %v33_v5  ;;  %v37_v9 = vfloor.f32 %v34_v6  ;;  %v38_v10 = vfloor.f32 %v35_v7 }
  0x21   :  { %40 = vst.msk [vmem:[#allocation6] sm:$0xff] %vm39_vm0, %v36_v8  ;;  %41 = vst.msk [vmem:[#allocation6 + $0x8] sm:$0xff] %vm39_vm0, %v37_v9 }
  0x22   :  { %43 = vst.msk [vmem:[#allocation6 + $0x10] sm:$0x1] %vm42_vm1, %v38_v10 }
  0x23   :  { %98 = shalt.err (!%p95_p9)
}
  0x24   :  { %55 = dma.vmem_to_hbm [thread:$0]  %s50_s19, 384, %s147_s2, [#allocation5], %s112_s12, %s112_s12, %s113_s13  }
  0x25   :  { %109 = dma.done.wait [#allocation5], 384  }
  0x26   :  { %110 = vsyncadd [#allocation5], 4294966912 }
  0x27   :  { %59 = vsyncpa [#allocation4], 1 }
  0x28   :  { %60 = vsyncpa [#allocation5], 1 }

</bundles_post_ra>
